<compile_context>
chip_gen: v7x
topology: tpu7x:2x2x1
jax: 0.10.0
libtpu: 0.0.40
codegen_flags: <defaults>
</compile_context>

<pallas_src>
import functools

import jax
import jax.numpy as jnp
from jax.experimental import pallas as pl
from jax.experimental.pallas import tpu as pltpu


def _round_up(x, m):
    return (x + m - 1) // m * m


def _make_kernel(tap_offsets, Q, Cout, inv_hw):
    """Fused conv (K*K accumulated matmuls) + InstanceNorm(affine=False) + ReLU."""

    def kernel(x_ref, w_ref, m_ref, o_ref):
        # x_ref: (1, Cin, L)      bf16  flattened reflection-padded image (zero-padded to L)
        # w_ref: (K*K, Cout, Cin) bf16  conv weight, tap-major
        # m_ref: (1, Q)           f32   validity mask over flattened spatial axis
        # o_ref: (1, Cout, Q)     f32   lane-dense output (NC(H*Wp) layout)
        acc = None
        for t, off in enumerate(tap_offsets):
            slab = x_ref[0, :, pl.ds(off, Q)]              # (Cin, Q) bf16, contiguous slice
            part = jnp.dot(w_ref[t], slab,                 # (Cout, Cin) @ (Cin, Q) on MXU
                           preferred_element_type=jnp.float32)
            acc = part if acc is None else acc + part      # (Cout, Q) f32

        # InstanceNorm2d(affine=False, eps=1e-5) over the valid spatial positions only.
        # (Conv bias omitted on purpose: a per-channel constant cancels under the mean.)
        mask = m_ref[...]                                  # (1, Q) f32
        mu = jnp.sum(acc * mask, axis=1, keepdims=True) * inv_hw          # (Cout, 1)
        d = (acc - mu) * mask                              # garbage columns -> 0
        var = jnp.sum(d * d, axis=1, keepdims=True) * inv_hw
        y = d * jax.lax.rsqrt(var + 1e-5)

        # ReLU
        o_ref[0] = jnp.maximum(y, 0.0)

    return kernel


@functools.partial(jax.jit, static_argnames=("kernel_size", "dilation"))
def conv_layer_forward(x, weight, bias, kernel_size, dilation=1):
    """ConvLayer forward. x: (B,Cin,H,W) f32, weight: (Cout,Cin,K,K), bias: (Cout,).

    bias is accepted for API fidelity but unused: it cancels exactly under
    InstanceNorm2d(affine=False).
    """
    del bias
    B, Cin, H, W = x.shape
    Cout = weight.shape[0]
    K = kernel_size
    pad = (K + (dilation - 1) * (K - 1)) // 2
    Hp, Wp = H + 2 * pad, W + 2 * pad

    # --- glue (pure data movement): reflection pad, flatten spatial, cast to bf16 ---
    xp = jnp.pad(x, ((0, 0), (0, 0), (pad, pad), (pad, pad)), mode="reflect")
    Q = H * Wp  # flattened output columns (includes Wp-W "wrap" columns per row)
    tap_offsets = tuple(ki * dilation * Wp + kj * dilation
                        for ki in range(K) for kj in range(K))
    L = _round_up(max(tap_offsets) + Q, 128)               # lane-aligned flattened length
    x_flat = xp.reshape(B, Cin, Hp * Wp)
    x_flat = jnp.pad(x_flat, ((0, 0), (0, 0), (0, L - Hp * Wp))).astype(jnp.bfloat16)

    # Weight laid out tap-major: (K*K, Cout, Cin), bf16 for the MXU.
    w_t = weight.transpose(2, 3, 0, 1).reshape(K * K, Cout, Cin).astype(jnp.bfloat16)

    # Validity mask over the flattened-with-row-pad spatial axis: (q % Wp) < W.
    q = jnp.arange(Q, dtype=jnp.int32)
    mask = ((q % Wp) < W).astype(jnp.float32).reshape(1, Q)

    kernel = _make_kernel(tap_offsets, Q, Cout, 1.0 / float(H * W))

    out = pl.pallas_call(
        kernel,
        out_shape=jax.ShapeDtypeStruct((B, Cout, Q), jnp.float32),
        grid_spec=pltpu.PrefetchScalarGridSpec(
            num_scalar_prefetch=0,
            grid=(B,),
            in_specs=[
                pl.BlockSpec((1, Cin, L), lambda b: (b, 0, 0)),
                pl.BlockSpec((K * K, Cout, Cin), lambda b: (0, 0, 0)),
                pl.BlockSpec((1, Q), lambda b: (0, 0)),
            ],
            out_specs=pl.BlockSpec((1, Cout, Q), lambda b: (b, 0, 0)),
        ),
        compiler_params=pltpu.CompilerParams(
            dimension_semantics=("parallel",)),
    )(x_flat, w_t, mask)

    # Drop the per-row wrap columns; the result is already NCHW (no transpose needed).
    return out.reshape(B, Cout, H, Wp)[:, :, :, :W]


def _reference(x, weight, bias, kernel_size, dilation=1):
    """Pure-JAX full-fidelity reference (includes the conv bias) for correctness."""
    K = kernel_size
    pad = (K + (dilation - 1) * (K - 1)) // 2
    xp = jnp.pad(x, ((0, 0), (0, 0), (pad, pad), (pad, pad)), mode="reflect")
    y = jax.lax.conv_general_dilated(
        xp, weight, window_strides=(1, 1), padding="VALID",
        rhs_dilation=(dilation, dilation),
        dimension_numbers=("NCHW", "OIHW", "NCHW"))
    y = y + bias.reshape(1, -1, 1, 1)
    mu = jnp.mean(y, axis=(2, 3), keepdims=True)
    var = jnp.mean((y - mu) ** 2, axis=(2, 3), keepdims=True)
    y = (y - mu) / jnp.sqrt(var + 1e-5)
    return jnp.maximum(y, 0.0)


if __name__ == "__main__":
    # ConvLayer(in_channels=4, out_channels=8, kernel_size=3) with defaults:
    # stride=1, dilation=1, bias=True, groups=1, norm='in', nonlinear='relu'.
    B, Cin, Cout, K, H, W = 2, 4, 8, 3, 16, 16

    key = jax.random.PRNGKey(0)
    kx, kw, kb = jax.random.split(key, 3)
    x = jax.random.normal(kx, (B, Cin, H, W), dtype=jnp.float32)
    weight = jax.random.normal(kw, (Cout, Cin, K, K), dtype=jnp.float32) * 0.1
    bias = jax.random.normal(kb, (Cout,), dtype=jnp.float32) * 0.1

    out = conv_layer_forward(x, weight, bias, kernel_size=K, dilation=1)
    out = jax.block_until_ready(out)

    ref = _reference(x, weight, bias, kernel_size=K, dilation=1)
    assert out.shape == (B, Cout, H, W)
    max_err = float(jnp.max(jnp.abs(out - ref)))
    assert jnp.allclose(out, ref, atol=3e-2, rtol=3e-2), f"mismatch vs reference (max err {max_err})"

    print("KERNEL_OK")
</pallas_src>

<mosaic_0001>
module attributes {stable_mosaic.version = 11 : i64} {
  func.func @kernel(%arg0: i32, %arg1: memref<1x4x384xbf16, #tpu.memory_space<vmem>>, %arg2: memref<9x8x4xbf16, #tpu.memory_space<vmem>>, %arg3: memref<1x288xf32, #tpu.memory_space<vmem>>, %arg4: memref<1x8x288xf32, #tpu.memory_space<vmem>>) attributes {dimension_semantics = [#tpu.dimension_semantics<parallel>], iteration_bounds = array<i64: 2>, scalar_prefetch = 0 : i64, scratch_operands = 0 : i64, tpu.core_type = #tpu.core_type<tc>, window_params = [{transform_indices = @transform_0, window_bounds = array<i64: 1, 4, 384>}, {pipeline_mode = #tpu.pipeline_mode<synchronous>, transform_indices = @transform_1, window_bounds = array<i64: 9, 8, 4>}, {pipeline_mode = #tpu.pipeline_mode<synchronous>, transform_indices = @transform_2, window_bounds = array<i64: 1, 288>}, {transform_indices = @transform_3, window_bounds = array<i64: 1, 8, 288>}]} {
    %c0 = arith.constant 0 : index
    %c0_0 = arith.constant 0 : index
    %c0_1 = arith.constant 0 : index
    %0 = vector.load %arg1[%c0, %c0_0, %c0_1] : memref<1x4x384xbf16, #tpu.memory_space<vmem>>, vector<1x4x288xbf16>
    %1 = vector.shape_cast %0 : vector<1x4x288xbf16> to vector<4x288xbf16>
    %c0_2 = arith.constant 0 : index
    %c0_3 = arith.constant 0 : index
    %c0_4 = arith.constant 0 : index
    %2 = vector.load %arg2[%c0_2, %c0_3, %c0_4] : memref<9x8x4xbf16, #tpu.memory_space<vmem>>, vector<1x8x4xbf16>
    %3 = vector.shape_cast %2 : vector<1x8x4xbf16> to vector<8x4xbf16>
    %cst = arith.constant dense<0.000000e+00> : vector<8x288xf32>
    %4 = tpu.matmul %3, %1, %cst {dimension_numbers = #tpu.dot_dimension_numbers<[1], [0], [0], [1], [0, 0, 1, 1], [], []>} : vector<8x4xbf16>, vector<4x288xbf16>, vector<8x288xf32> -> vector<8x288xf32>
    %c0_5 = arith.constant 0 : index
    %c0_6 = arith.constant 0 : index
    %c1 = arith.constant 1 : index
    %5 = vector.load %arg1[%c0_5, %c0_6, %c1] : memref<1x4x384xbf16, #tpu.memory_space<vmem>>, vector<1x4x288xbf16>
    %6 = vector.shape_cast %5 : vector<1x4x288xbf16> to vector<4x288xbf16>
    %c1_7 = arith.constant 1 : index
    %c0_8 = arith.constant 0 : index
    %c0_9 = arith.constant 0 : index
    %7 = vector.load %arg2[%c1_7, %c0_8, %c0_9] : memref<9x8x4xbf16, #tpu.memory_space<vmem>>, vector<1x8x4xbf16>
    %8 = vector.shape_cast %7 : vector<1x8x4xbf16> to vector<8x4xbf16>
    %cst_10 = arith.constant dense<0.000000e+00> : vector<8x288xf32>
    %9 = tpu.matmul %8, %6, %cst_10 {dimension_numbers = #tpu.dot_dimension_numbers<[1], [0], [0], [1], [0, 0, 1, 1], [], []>} : vector<8x4xbf16>, vector<4x288xbf16>, vector<8x288xf32> -> vector<8x288xf32>
    %10 = arith.addf %4, %9 : vector<8x288xf32>
    %c0_11 = arith.constant 0 : index
    %c0_12 = arith.constant 0 : index
    %c2 = arith.constant 2 : index
    %11 = vector.load %arg1[%c0_11, %c0_12, %c2] : memref<1x4x384xbf16, #tpu.memory_space<vmem>>, vector<1x4x288xbf16>
    %12 = vector.shape_cast %11 : vector<1x4x288xbf16> to vector<4x288xbf16>
    %c2_13 = arith.constant 2 : index
    %c0_14 = arith.constant 0 : index
    %c0_15 = arith.constant 0 : index
    %13 = vector.load %arg2[%c2_13, %c0_14, %c0_15] : memref<9x8x4xbf16, #tpu.memory_space<vmem>>, vector<1x8x4xbf16>
    %14 = vector.shape_cast %13 : vector<1x8x4xbf16> to vector<8x4xbf16>
    %cst_16 = arith.constant dense<0.000000e+00> : vector<8x288xf32>
    %15 = tpu.matmul %14, %12, %cst_16 {dimension_numbers = #tpu.dot_dimension_numbers<[1], [0], [0], [1], [0, 0, 1, 1], [], []>} : vector<8x4xbf16>, vector<4x288xbf16>, vector<8x288xf32> -> vector<8x288xf32>
    %16 = arith.addf %10, %15 : vector<8x288xf32>
    %c0_17 = arith.constant 0 : index
    %c0_18 = arith.constant 0 : index
    %c18 = arith.constant 18 : index
    %17 = vector.load %arg1[%c0_17, %c0_18, %c18] : memref<1x4x384xbf16, #tpu.memory_space<vmem>>, vector<1x4x288xbf16>
    %18 = vector.shape_cast %17 : vector<1x4x288xbf16> to vector<4x288xbf16>
    %c3 = arith.constant 3 : index
    %c0_19 = arith.constant 0 : index
    %c0_20 = arith.constant 0 : index
    %19 = vector.load %arg2[%c3, %c0_19, %c0_20] : memref<9x8x4xbf16, #tpu.memory_space<vmem>>, vector<1x8x4xbf16>
    %20 = vector.shape_cast %19 : vector<1x8x4xbf16> to vector<8x4xbf16>
    %cst_21 = arith.constant dense<0.000000e+00> : vector<8x288xf32>
    %21 = tpu.matmul %20, %18, %cst_21 {dimension_numbers = #tpu.dot_dimension_numbers<[1], [0], [0], [1], [0, 0, 1, 1], [], []>} : vector<8x4xbf16>, vector<4x288xbf16>, vector<8x288xf32> -> vector<8x288xf32>
    %22 = arith.addf %16, %21 : vector<8x288xf32>
    %c0_22 = arith.constant 0 : index
    %c0_23 = arith.constant 0 : index
    %c19 = arith.constant 19 : index
    %23 = vector.load %arg1[%c0_22, %c0_23, %c19] : memref<1x4x384xbf16, #tpu.memory_space<vmem>>, vector<1x4x288xbf16>
    %24 = vector.shape_cast %23 : vector<1x4x288xbf16> to vector<4x288xbf16>
    %c4 = arith.constant 4 : index
    %c0_24 = arith.constant 0 : index
    %c0_25 = arith.constant 0 : index
    %25 = vector.load %arg2[%c4, %c0_24, %c0_25] : memref<9x8x4xbf16, #tpu.memory_space<vmem>>, vector<1x8x4xbf16>
    %26 = vector.shape_cast %25 : vector<1x8x4xbf16> to vector<8x4xbf16>
    %cst_26 = arith.constant dense<0.000000e+00> : vector<8x288xf32>
    %27 = tpu.matmul %26, %24, %cst_26 {dimension_numbers = #tpu.dot_dimension_numbers<[1], [0], [0], [1], [0, 0, 1, 1], [], []>} : vector<8x4xbf16>, vector<4x288xbf16>, vector<8x288xf32> -> vector<8x288xf32>
    %28 = arith.addf %22, %27 : vector<8x288xf32>
    %c0_27 = arith.constant 0 : index
    %c0_28 = arith.constant 0 : index
    %c20 = arith.constant 20 : index
    %29 = vector.load %arg1[%c0_27, %c0_28, %c20] : memref<1x4x384xbf16, #tpu.memory_space<vmem>>, vector<1x4x288xbf16>
    %30 = vector.shape_cast %29 : vector<1x4x288xbf16> to vector<4x288xbf16>
    %c5 = arith.constant 5 : index
    %c0_29 = arith.constant 0 : index
    %c0_30 = arith.constant 0 : index
    %31 = vector.load %arg2[%c5, %c0_29, %c0_30] : memref<9x8x4xbf16, #tpu.memory_space<vmem>>, vector<1x8x4xbf16>
    %32 = vector.shape_cast %31 : vector<1x8x4xbf16> to vector<8x4xbf16>
    %cst_31 = arith.constant dense<0.000000e+00> : vector<8x288xf32>
    %33 = tpu.matmul %32, %30, %cst_31 {dimension_numbers = #tpu.dot_dimension_numbers<[1], [0], [0], [1], [0, 0, 1, 1], [], []>} : vector<8x4xbf16>, vector<4x288xbf16>, vector<8x288xf32> -> vector<8x288xf32>
    %34 = arith.addf %28, %33 : vector<8x288xf32>
    %c0_32 = arith.constant 0 : index
    %c0_33 = arith.constant 0 : index
    %c36 = arith.constant 36 : index
    %35 = vector.load %arg1[%c0_32, %c0_33, %c36] : memref<1x4x384xbf16, #tpu.memory_space<vmem>>, vector<1x4x288xbf16>
    %36 = vector.shape_cast %35 : vector<1x4x288xbf16> to vector<4x288xbf16>
    %c6 = arith.constant 6 : index
    %c0_34 = arith.constant 0 : index
    %c0_35 = arith.constant 0 : index
    %37 = vector.load %arg2[%c6, %c0_34, %c0_35] : memref<9x8x4xbf16, #tpu.memory_space<vmem>>, vector<1x8x4xbf16>
    %38 = vector.shape_cast %37 : vector<1x8x4xbf16> to vector<8x4xbf16>
    %cst_36 = arith.constant dense<0.000000e+00> : vector<8x288xf32>
    %39 = tpu.matmul %38, %36, %cst_36 {dimension_numbers = #tpu.dot_dimension_numbers<[1], [0], [0], [1], [0, 0, 1, 1], [], []>} : vector<8x4xbf16>, vector<4x288xbf16>, vector<8x288xf32> -> vector<8x288xf32>
    %40 = arith.addf %34, %39 : vector<8x288xf32>
    %c0_37 = arith.constant 0 : index
    %c0_38 = arith.constant 0 : index
    %c37 = arith.constant 37 : index
    %41 = vector.load %arg1[%c0_37, %c0_38, %c37] : memref<1x4x384xbf16, #tpu.memory_space<vmem>>, vector<1x4x288xbf16>
    %42 = vector.shape_cast %41 : vector<1x4x288xbf16> to vector<4x288xbf16>
    %c7 = arith.constant 7 : index
    %c0_39 = arith.constant 0 : index
    %c0_40 = arith.constant 0 : index
    %43 = vector.load %arg2[%c7, %c0_39, %c0_40] : memref<9x8x4xbf16, #tpu.memory_space<vmem>>, vector<1x8x4xbf16>
    %44 = vector.shape_cast %43 : vector<1x8x4xbf16> to vector<8x4xbf16>
    %cst_41 = arith.constant dense<0.000000e+00> : vector<8x288xf32>
    %45 = tpu.matmul %44, %42, %cst_41 {dimension_numbers = #tpu.dot_dimension_numbers<[1], [0], [0], [1], [0, 0, 1, 1], [], []>} : vector<8x4xbf16>, vector<4x288xbf16>, vector<8x288xf32> -> vector<8x288xf32>
    %46 = arith.addf %40, %45 : vector<8x288xf32>
    %c0_42 = arith.constant 0 : index
    %c0_43 = arith.constant 0 : index
    %c38 = arith.constant 38 : index
    %47 = vector.load %arg1[%c0_42, %c0_43, %c38] : memref<1x4x384xbf16, #tpu.memory_space<vmem>>, vector<1x4x288xbf16>
    %48 = vector.shape_cast %47 : vector<1x4x288xbf16> to vector<4x288xbf16>
    %c8 = arith.constant 8 : index
    %c0_44 = arith.constant 0 : index
    %c0_45 = arith.constant 0 : index
    %49 = vector.load %arg2[%c8, %c0_44, %c0_45] : memref<9x8x4xbf16, #tpu.memory_space<vmem>>, vector<1x8x4xbf16>
    %50 = vector.shape_cast %49 : vector<1x8x4xbf16> to vector<8x4xbf16>
    %cst_46 = arith.constant dense<0.000000e+00> : vector<8x288xf32>
    %51 = tpu.matmul %50, %48, %cst_46 {dimension_numbers = #tpu.dot_dimension_numbers<[1], [0], [0], [1], [0, 0, 1, 1], [], []>} : vector<8x4xbf16>, vector<4x288xbf16>, vector<8x288xf32> -> vector<8x288xf32>
    %52 = arith.addf %46, %51 : vector<8x288xf32>
    %c0_47 = arith.constant 0 : index
    %c0_48 = arith.constant 0 : index
    %53 = vector.load %arg3[%c0_47, %c0_48] : memref<1x288xf32, #tpu.memory_space<vmem>>, vector<1x288xf32>
    %54 = vector.broadcast %53 : vector<1x288xf32> to vector<8x288xf32>
    %55 = arith.mulf %52, %54 : vector<8x288xf32>
    %cst_49 = arith.constant dense<0.000000e+00> : vector<8xf32>
    %56 = vector.multi_reduction <add>, %55, %cst_49 [1] : vector<8x288xf32> to vector<8xf32>
    %57 = vector.shape_cast %56 : vector<8xf32> to vector<8x1xf32>
    %cst_50 = arith.constant 3.906250e-03 : f32
    %58 = vector.broadcast %cst_50 : f32 to vector<8x1xf32>
    %59 = arith.mulf %57, %58 : vector<8x1xf32>
    %60 = vector.broadcast %59 : vector<8x1xf32> to vector<8x288xf32>
    %61 = arith.subf %52, %60 : vector<8x288xf32>
    %62 = vector.broadcast %53 : vector<1x288xf32> to vector<8x288xf32>
    %63 = arith.mulf %61, %62 : vector<8x288xf32>
    %64 = arith.mulf %63, %63 : vector<8x288xf32>
    %cst_51 = arith.constant dense<0.000000e+00> : vector<8xf32>
    %65 = vector.multi_reduction <add>, %64, %cst_51 [1] : vector<8x288xf32> to vector<8xf32>
    %66 = vector.shape_cast %65 : vector<8xf32> to vector<8x1xf32>
    %cst_52 = arith.constant 3.906250e-03 : f32
    %67 = vector.broadcast %cst_52 : f32 to vector<8x1xf32>
    %68 = arith.mulf %66, %67 : vector<8x1xf32>
    %cst_53 = arith.constant 9.99999974E-6 : f32
    %69 = vector.broadcast %cst_53 : f32 to vector<8x1xf32>
    %70 = arith.addf %68, %69 : vector<8x1xf32>
    %71 = math.rsqrt %70 : vector<8x1xf32>
    %72 = vector.broadcast %71 : vector<8x1xf32> to vector<8x288xf32>
    %73 = arith.mulf %63, %72 : vector<8x288xf32>
    %cst_54 = arith.constant 0.000000e+00 : f32
    %74 = vector.broadcast %cst_54 : f32 to vector<8x288xf32>
    %75 = arith.maximumf %73, %74 : vector<8x288xf32>
    %c0_55 = arith.constant 0 : index
    %c0_56 = arith.constant 0 : index
    %c0_57 = arith.constant 0 : index
    %76 = vector.load %arg4[%c0_55, %c0_56, %c0_57] : memref<1x8x288xf32, #tpu.memory_space<vmem>>, vector<1x8x288xf32>
    %77 = vector.shape_cast %76 : vector<1x8x288xf32> to vector<8x288xf32>
    %78 = vector.shape_cast %75 : vector<8x288xf32> to vector<1x8x288xf32>
    tpu.vector_store %arg4[%c0_55, %c0_56, %c0_57], %78 {strides = array<i32>} : memref<1x8x288xf32, #tpu.memory_space<vmem>>, vector<1x8x288xf32>,
    return
  }
  func.func @transform_0(%arg0: i32) -> (i32, i32, i32) {
    %c0_i32 = arith.constant 0 : i32
    %c0_i32_0 = arith.constant 0 : i32
    %c0_i32_1 = arith.constant 0 : i32
    return %arg0, %c0_i32, %c0_i32_0 : i32, i32, i32
  }
  func.func @transform_1(%arg0: i32) -> (i32, i32, i32) {
    %c0_i32 = arith.constant 0 : i32
    %c0_i32_0 = arith.constant 0 : i32
    %c0_i32_1 = arith.constant 0 : i32
    %c0_i32_2 = arith.constant 0 : i32
    return %c0_i32, %c0_i32_0, %c0_i32_1 : i32, i32, i32
  }
  func.func @transform_2(%arg0: i32) -> (i32, i32) {
    %c0_i32 = arith.constant 0 : i32
    %c0_i32_0 = arith.constant 0 : i32
    %c0_i32_1 = arith.constant 0 : i32
    return %c0_i32, %c0_i32_0 : i32, i32
  }
  func.func @transform_3(%arg0: i32) -> (i32, i32, i32) {
    %c0_i32 = arith.constant 0 : i32
    %c0_i32_0 = arith.constant 0 : i32
    %c0_i32_1 = arith.constant 0 : i32
    return %arg0, %c0_i32, %c0_i32_0 : i32, i32, i32
  }
}

</mosaic_0001>

<bundles_post_ra>
// kernel: conv_layer_forward.1
= control target key start
LH: loop header
LB: loop body
LE: loop exit
PB: predicated region body
PF: predicated region fallthrough
CT: control target
= control target key end

     0   :  { %s1625_s12 = smov 0   ;;  %s1808_s0 = inlined_call_operand.vmem [shape: bf16[2,4,384], index: 0, kind: input, shape index: {}]   ;;  %s1809_s1 = inlined_call_operand.vmem [shape: bf16[9,8,4], index: 1, kind: input, shape index: {}]   ;;  %s1810_s2 = inlined_call_operand.vmem [shape: f32[1,288], index: 2, kind: input, shape index: {}]   ;;  %s1811_s3 = inlined_call_operand.vmem [shape: f32[2,8,288], index: 3, kind: output, shape index: {}]  }
   0x1 LB: > { %s1373_s13 = sadd.s32 4294967295, %s1591_s12   ;;  %p1377_p0 = scmp.ge.s32.totalorder %s1591_s12, 1  ;;  %s1591_s12 = sphi %s1625_s12, %s13_s12  }
   0x2   : > { %p137_p1 = scmp.lt.s32.totalorder %s1591_s12, 3 }
   0x4   : > { %p138_p2 = pnand %p1377_p0, %p137_p1 }
   0x5   : > { %p161_p3 = scmp.lt.s32.totalorder (!%p138_p2), %s1373_s13, 1  ;;  %v181_v0 = vlaneseq (!%p138_p2)  ;;  %v1593_v1 = vmov (!%p138_p2), 1983009808   ;;  %v1594_v3 = vmov (!%p138_p2), 0.0   ;;  %vm1595_vm0 = vmmov (!%p138_p2), 0   ;;  %s1597_s18 = smov (!%p138_p2), 127  }
   0x6   : > { %141 = sbr.rel (%p138_p2) target bundleno = 776 (0x308), region = 32  ;;  %v179_v2 = vunpack.c.l.s4 (!%p138_p2), %v1593_v1  ;;  %1435 = vmatprep.subr.bf16.mxu1 (!%p138_p2), %v1594_v3  ;;  %1437 = vmatprep.mubr.msk.bf16.mxu1 (!%p138_p2), %vm1595_vm0, %v1594_v3  ;;  %v1596_v6 = vmov (!%p138_p2), 0   ;;  %s1598_s19 = smov (!%p138_p2), 126   ;;  %vm206_vm1 = vcmask (!%p138_p2), 1041408   ;;  %vm199_vm2 = vcmask (!%p138_p2), 1039360  }
   0x7   : > { %v1636_v4 = vshrl.u32 (!%p138_p2), %v181_v0, 7  ;;  %248 = vmatprep.mubr.bf16.mxu0 (!%p138_p2), %v1596_v6  ;;  %s1599_s20 = smov (!%p138_p2), 110   ;;  %s1600_s21 = smov (!%p138_p2), 109   ;;  %v1380_v52 = vld [vmem:[%s1809_s1 + $0x4] sm:$0xf] (!%p138_p2)  ;;  %vm202_vm3 = vcmask (!%p138_p2), 31744  }
   0x8   : > { %v180_v5 = vunpack.c.0.s8 (!%p138_p2), %v179_v2  ;;  %s1601_s22 = smov (!%p138_p2), 108   ;;  %s1602_s23 = smov (!%p138_p2), 92   ;;  %vm416_vm4 = vcmask (!%p138_p2), 1031168   ;;  %v173_v63 = vld [vmem:[%s1809_s1] sm:$0xf] (!%p138_p2)  ;;  %vm541_vm5 = vcmask (!%p138_p2), 900096  }
   0x9   : > { %s1603_s24 = smov (!%p138_p2), 91   ;;  %s1604_s25 = smov (!%p138_p2), 90   ;;  %vm666_vm6 = vcmask (!%p138_p2), 891904   ;;  %vm791_vm7 = vcmask (!%p138_p2), 883712   ;;  %vm916_vm8 = vcmask (!%p138_p2), 752640   ;;  %vm1041_vm9 = vcmask (!%p138_p2), 744448  }
   0xa   : > { %v1643_v7 = vsub.s32 (!%p138_p2), %v180_v5, %v1636_v4  ;;  %vm1166_vm10 = vcmask (!%p138_p2), 736256   ;;  %vm1286_vm11 = vcmask (!%p138_p2), 261120  }
   0xd   : > { %s1813_s13 = smov (!%p161_p3, %s1373_s13), 1 }
   0xe   : > { %s1553_s14 = smul.u32 6, %s1813_s13 }
  0x10   : > { %s1648_s17 = scalar_lea.vmem %s1808_s0, %s1553_s14 }
  0x11   : > { %v172_v8 = vld [vmem:[%s1648_s17] sm:$0x3f] }
  0x12   : > { %v1652_v9 = vrot.slane %v172_v8, %v1643_v7  ;;  %v177_v10 = vcombine.high %v172_v8, %v172_v8  ;;  %v390_v11 = vld [vmem:[%s1648_s17] sm:$0x3f] }
  0x13   : > { %v401_v14 = vrot.slane %v390_v11, %v1643_v7  ;;  %v394_v15 = vcombine.high %v390_v11, %v390_v11  ;;  %v515_v17 = vld [vmem:[%s1648_s17] sm:$0x3f] }
  0x14   : > { %193 = vrot.lane.b32.xlu0 %v1652_v9, %s1597_s18  ;;  %v1657_v12 = vrot.slane %v177_v10, %v1643_v7  ;;  %v1661_v13 = vcombine.high %v1652_v9, %v1652_v9  ;;  %v526_v19 = vrot.slane %v515_v17, %v1643_v7  ;;  %v519_v20 = vcombine.high %v515_v17, %v515_v17  ;;  %v640_v22 = vld [vmem:[%s1648_s17] sm:$0x3f]  ;;  %v1387_v10 = vld [vmem:[%s1809_s1 + $0x8] sm:$0xf] }
  0x15   : > { %v409_v16 = vcombine.high %v401_v14, %v401_v14  ;;  %v408_v18 = vrot.slane %v394_v15, %v1643_v7  ;;  %v651_v24 = vrot.slane %v640_v22, %v1643_v7  ;;  %v644_v25 = vcombine.high %v640_v22, %v640_v22  ;;  %v765_v27 = vld [vmem:[%s1648_s17] sm:$0x3f] }
  0x16   : > { %197 = vrot.lane.b32.xlu1 %v1657_v12, %s1597_s18  ;;  %v534_v21 = vcombine.high %v526_v19, %v526_v19  ;;  %v533_v23 = vrot.slane %v519_v20, %v1643_v7  ;;  %v776_v29 = vrot.slane %v765_v27, %v1643_v7  ;;  %v769_v30 = vcombine.high %v765_v27, %v765_v27  ;;  %v890_v32 = vld [vmem:[%s1648_s17] sm:$0x3f] }
  0x17   : > { %v659_v26 = vcombine.high %v651_v24, %v651_v24  ;;  %v658_v28 = vrot.slane %v644_v25, %v1643_v7  ;;  %v901_v34 = vrot.slane %v890_v32, %v1643_v7  ;;  %v894_v35 = vcombine.high %v890_v32, %v890_v32  ;;  %v1015_v37 = vld [vmem:[%s1648_s17] sm:$0x3f] }
  0x18   : > { %195 = vrot.lane.b32.xlu0 %v1661_v13, %s1597_s18  ;;  %v784_v31 = vcombine.high %v776_v29, %v776_v29  ;;  %v783_v33 = vrot.slane %v769_v30, %v1643_v7  ;;  %v1026_v39 = vrot.slane %v1015_v37, %v1643_v7  ;;  %v1019_v40 = vcombine.high %v1015_v37, %v1015_v37  ;;  %v1140_v42 = vld [vmem:[%s1648_s17] sm:$0x3f] }
  0x19   : > { %v909_v36 = vcombine.high %v901_v34, %v901_v34  ;;  %v908_v38 = vrot.slane %v894_v35, %v1643_v7  ;;  %v1151_v44 = vrot.slane %v1140_v42, %v1643_v7  ;;  %v1144_v45 = vcombine.high %v1140_v42, %v1140_v42  ;;  %v1403_v42 = vld [vmem:[%s1809_s1 + $0x18] sm:$0xf] }
  0x1a   : > { %410 = vrot.lane.b32.xlu1 %v401_v14, %s1598_s19  ;;  %v1034_v41 = vcombine.high %v1026_v39, %v1026_v39  ;;  %v1033_v43 = vrot.slane %v1019_v40, %v1643_v7  ;;  %v307_v55 = vsel %vm206_vm1, %v1657_v12, 0  ;;  %v301_v58 = vsel %vm206_vm1, %v1652_v9, 0 }
  0x1b   : > { %v1159_v46 = vcombine.high %v1151_v44, %v1151_v44  ;;  %v1158_v47 = vrot.slane %v1144_v45, %v1643_v7 }
  0x1c   : > { %412 = vrot.lane.b32.xlu0 %v409_v16, %s1598_s19 }
  0x1e   : > { %414 = vrot.lane.b32.xlu1 %v408_v18, %s1598_s19  ;;  %v1391_v18 = vld [vmem:[%s1809_s1 + $0xc] sm:$0xf] }
  0x20   : > { %535 = vrot.lane.b32.xlu0 %v526_v19, %s1599_s20 }
  0x22   : > { %537 = vrot.lane.b32.xlu1 %v534_v21, %s1599_s20 }
  0x24   : > { %539 = vrot.lane.b32.xlu0 %v533_v23, %s1599_s20 }
  0x26   : > { %660 = vrot.lane.b32.xlu1 %v651_v24, %s1600_s21 }
  0x28   : > { %662 = vrot.lane.b32.xlu0 %v659_v26, %s1600_s21  ;;  %v1395_v26 = vld [vmem:[%s1809_s1 + $0x10] sm:$0xf] }
  0x2a   : > { %664 = vrot.lane.b32.xlu1 %v658_v28, %s1600_s21  ;;  %s1554_s21 = smul.u32 24, %s1813_s13 }
  0x2c   : > { %785 = vrot.lane.b32.xlu0 %v776_v29, %s1601_s22 }
  0x2e   : > { %787 = vrot.lane.b32.xlu1 %v784_v31, %s1601_s22 }
  0x30   : > { %789 = vrot.lane.b32.xlu0 %v783_v33, %s1601_s22 }
  0x32   : > { %910 = vrot.lane.b32.xlu1 %v901_v34, %s1602_s23  ;;  %v1399_v34 = vld [vmem:[%s1809_s1 + $0x14] sm:$0xf] }
  0x34   : > { %912 = vrot.lane.b32.xlu0 %v909_v36, %s1602_s23 }
  0x36   : > { %914 = vrot.lane.b32.xlu1 %v908_v38, %s1602_s23 }
  0x38   : > { %1035 = vrot.lane.b32.xlu0 %v1026_v39, %s1603_s24 }
  0x3a   : > { %1037 = vrot.lane.b32.xlu1 %v1034_v41, %s1603_s24 }
  0x3c   : > { %1039 = vrot.lane.b32.xlu0 %v1033_v43, %s1603_s24  ;;  %s170_s24 = scalar_lea.vmem %s1811_s3, %s1554_s21 }
  0x3e   : > { %1160 = vrot.lane.b32.xlu1 %v1151_v44, %s1604_s25 }
  0x40   : > { %1162 = vrot.lane.b32.xlu0 %v1159_v46, %s1604_s25 }
  0x42   : > { %1164 = vrot.lane.b32.xlu1 %v1158_v47, %s1604_s25 }
  0x86   : > { %v194_v48 = vpop.permute.xlu0 %193 }
  0x88   : > { %v198_v49 = vpop.permute.xlu1 %197 }
  0x89   : > { %v214_v50 = vsel %vm206_vm1, %v198_v49, 0 }
  0x8a   : > { %v196_v51 = vpop.permute.xlu0 %195  ;;  %1436 = vmatpush3.bf16.msra.mxu1 %v214_v50 }
  0x8b   : > { %v201_v53 = vsel %vm199_vm2, %v196_v51, %v198_v49  ;;  %v200_v54 = vsel %vm199_vm2, %v194_v48, %v196_v51  ;;  %1441 = vmatprep.subr.bf16.mxu1 %v1594_v3  ;;  %v1407_v49 = vld [vmem:[%s1809_s1 + $0x1c] sm:$0xf] }
  0x8c   : > { %1381 = vmatprep.subr.msk.bf16.mxu0 %vm206_vm1, %v201_v53  ;;  %v208_v56 = vsel %vm206_vm1, %v200_v54, 0  ;;  %v411_v57 = vpop.permute.xlu1 %410  ;;  %v1411_v53 = vld [vmem:[%s1809_s1 + $0x20] sm:$0xf]  ;;  %v1277_v54 = vsub.s32 2, %v1636_v4 }
  0x8d   : > { %217 = vmatpush1.bf16.msra.mxu0 %v208_v56  ;;  %1438 = vmatmul.mubr.msk.bf16.vlgmr.msra.gmra.mrb[0].mxu1 %vm202_vm3, %v1380_v52  ;;  %v1273_v56 = vsub.s32 1, %v1636_v4 }
  0x8e   : > { %1384 = vmatprep.subr.msk.bf16.mxu0 %vm206_vm1, %v1661_v13  ;;  %1442 = vmatpush3.bf16.msra.mxu1 %v307_v55  ;;  %v413_v59 = vpop.permute.xlu0 %412  ;;  %v1269_v55 = vsub.s32 0, %v1636_v4 }
  0x8f   : > { %1443 = vmatprep.mubr.msk.bf16.mxu1 %vm1595_vm0, %v1594_v3  ;;  %1447 = vmatprep.subr.bf16.mxu1 %v1594_v3  ;;  %v417_v0 = vsel %vm416_vm4, %v411_v57, %v413_v59 }
  0x90   : > { %1382 = vmatmul.mubr.msk.bf16.vlgmr.msra.gmra.mrb[0].mxu0 %vm202_vm3, %v1380_v52  ;;  %v415_v60 = vpop.permute.xlu1 %414  ;;  %v423_v7 = vsel %vm206_vm1, %v417_v0, 0 }
  0x91   : > { %310 = vmatpush1.bf16.msra.mxu0 %v301_v58  ;;  %v418_v61 = vsel %vm416_vm4, %v413_v59, %v415_v60  ;;  %341 = vmatprep.mubr.bf16.mxu0 %v1596_v6  ;;  %v429_v1 = vsel %vm206_vm1, %v415_v60, 0 }
  0x92   : > { %1388 = vmatprep.subr.msk.bf16.mxu0 %vm206_vm1, %v418_v61  ;;  %v536_v62 = vpop.permute.xlu0 %535 }
  0x94   : > { %v538_v2 = vpop.permute.xlu1 %537 }
  0x95   : > { %v542_v11 = vsel %vm541_vm5, %v536_v62, %v538_v2 }
  0x96   : > { %v540_v5 = vpop.permute.xlu0 %539  ;;  %v548_v15 = vsel %vm206_vm1, %v542_v11, 0 }
  0x97   : > { %v543_v8 = vsel %vm541_vm5, %v538_v2, %v540_v5  ;;  %v554_v12 = vsel %vm206_vm1, %v540_v5, 0 }
  0x98   : > { %v661_v9 = vpop.permute.xlu1 %660 }
  0x99   : > { %1444 = vmatmul.mubr.msk.bf16.vlgmr.msra.gmra.mrb[0].mxu1 %vm202_vm3, %v173_v63 }
  0x9a   : > { %1448 = vmatpush3.bf16.msra.mxu1 %v429_v1  ;;  %1449 = vmatprep.mubr.msk.bf16.mxu1 %vm1595_vm0, %v1594_v3  ;;  %v663_v13 = vpop.permute.xlu0 %662 }
  0x9b   : > { %1453 = vmatprep.subr.bf16.mxu1 %v1594_v3  ;;  %v667_v19 = vsel %vm666_vm6, %v661_v9, %v663_v13 }
  0x9c   : > { %1385 = vmatmul.mubr.msk.bf16.vlgmr.msra.gmra.mrb[0].mxu0 %vm202_vm3, %v173_v63  ;;  %v665_v14 = vpop.permute.xlu1 %664  ;;  %v673_v23 = vsel %vm206_vm1, %v667_v19, 0 }
  0x9d   : > { %432 = vmatpush1.bf16.msra.mxu0 %v423_v7  ;;  %463 = vmatprep.mubr.bf16.mxu0 %v1596_v6  ;;  %v668_v16 = vsel %vm666_vm6, %v663_v13, %v665_v14  ;;  %v679_v20 = vsel %vm206_vm1, %v665_v14, 0 }
  0x9e   : > { %1392 = vmatprep.subr.msk.bf16.mxu0 %vm206_vm1, %v543_v8  ;;  %v786_v17 = vpop.permute.xlu0 %785 }
  0xa0   : > { %v788_v21 = vpop.permute.xlu1 %787 }
  0xa1   : > { %v792_v27 = vsel %vm791_vm7, %v786_v17, %v788_v21 }
  0xa2   : > { %v790_v22 = vpop.permute.xlu0 %789  ;;  %v798_v31 = vsel %vm206_vm1, %v792_v27, 0 }
  0xa3   : > { %v793_v24 = vsel %vm791_vm7, %v788_v21, %v790_v22  ;;  %v804_v28 = vsel %vm206_vm1, %v790_v22, 0 }
  0xa4   : > { %v911_v25 = vpop.permute.xlu1 %910 }
  0xa5   : > { %1450 = vmatmul.mubr.msk.bf16.vlgmr.msra.gmra.mrb[0].mxu1 %vm202_vm3, %v1387_v10 }
  0xa6   : > { %1454 = vmatpush3.bf16.msra.mxu1 %v554_v12  ;;  %1455 = vmatprep.mubr.msk.bf16.mxu1 %vm1595_vm0, %v1594_v3  ;;  %v913_v29 = vpop.permute.xlu0 %912 }
  0xa7   : > { %1459 = vmatprep.subr.bf16.mxu1 %v1594_v3  ;;  %v917_v35 = vsel %vm916_vm8, %v911_v25, %v913_v29 }
  0xa8   : > { %1389 = vmatmul.mubr.msk.bf16.vlgmr.msra.gmra.mrb[0].mxu0 %vm202_vm3, %v1387_v10  ;;  %v915_v30 = vpop.permute.xlu1 %914  ;;  %v923_v39 = vsel %vm206_vm1, %v917_v35, 0 }
  0xa9   : > { %557 = vmatpush1.bf16.msra.mxu0 %v548_v15  ;;  %588 = vmatprep.mubr.bf16.mxu0 %v1596_v6  ;;  %v918_v32 = vsel %vm916_vm8, %v913_v29, %v915_v30  ;;  %v929_v36 = vsel %vm206_vm1, %v915_v30, 0 }
  0xaa   : > { %1396 = vmatprep.subr.msk.bf16.mxu0 %vm206_vm1, %v668_v16  ;;  %v1036_v33 = vpop.permute.xlu0 %1035 }
  0xac   : > { %v1038_v37 = vpop.permute.xlu1 %1037 }
  0xad   : > { %v1042_v43 = vsel %vm1041_vm9, %v1036_v33, %v1038_v37 }
  0xae   : > { %v1040_v38 = vpop.permute.xlu0 %1039  ;;  %v1048_v47 = vsel %vm206_vm1, %v1042_v43, 0 }
  0xaf   : > { %v1043_v40 = vsel %vm1041_vm9, %v1038_v37, %v1040_v38  ;;  %v1054_v44 = vsel %vm206_vm1, %v1040_v38, 0 }
  0xb0   : > { %v1161_v41 = vpop.permute.xlu1 %1160 }
  0xb1   : > { %1456 = vmatmul.mubr.msk.bf16.vlgmr.msra.gmra.mrb[0].mxu1 %vm202_vm3, %v1391_v18 }
  0xb2   : > { %1460 = vmatpush3.bf16.msra.mxu1 %v679_v20  ;;  %1461 = vmatprep.mubr.msk.bf16.mxu1 %vm1595_vm0, %v1594_v3  ;;  %v1163_v45 = vpop.permute.xlu0 %1162 }
  0xb3   : > { %1465 = vmatprep.subr.bf16.mxu1 %v1594_v3  ;;  %v1167_v50 = vsel %vm1166_vm10, %v1161_v41, %v1163_v45 }
  0xb4   : > { %1393 = vmatmul.mubr.msk.bf16.vlgmr.msra.gmra.mrb[0].mxu0 %vm202_vm3, %v1391_v18  ;;  %v1165_v46 = vpop.permute.xlu1 %1164  ;;  %v1173_v52 = vsel %vm206_vm1, %v1167_v50, 0 }
  0xb5   : > { %682 = vmatpush1.bf16.msra.mxu0 %v673_v23  ;;  %713 = vmatprep.mubr.bf16.mxu0 %v1596_v6  ;;  %v1168_v48 = vsel %vm1166_vm10, %v1163_v45, %v1165_v46  ;;  %v1179_v51 = vsel %vm206_vm1, %v1165_v46, 0 }
  0xb6   : > { %1400 = vmatprep.subr.msk.bf16.mxu0 %vm206_vm1, %v793_v24 }
  0xbd   : > { %1462 = vmatmul.mubr.msk.bf16.vlgmr.msra.gmra.mrb[0].mxu1 %vm202_vm3, %v1395_v26 }
  0xbe   : > { %1466 = vmatpush3.bf16.msra.mxu1 %v804_v28  ;;  %1467 = vmatprep.mubr.msk.bf16.mxu1 %vm1595_vm0, %v1594_v3 }
  0xbf   : > { %1471 = vmatprep.subr.bf16.mxu1 %v1594_v3 }
  0xc0   : > { %1397 = vmatmul.mubr.msk.bf16.vlgmr.msra.gmra.mrb[0].mxu0 %vm202_vm3, %v1395_v26 }
  0xc1   : > { %807 = vmatpush1.bf16.msra.mxu0 %v798_v31  ;;  %838 = vmatprep.mubr.bf16.mxu0 %v1596_v6 }
  0xc2   : > { %1404 = vmatprep.subr.msk.bf16.mxu0 %vm206_vm1, %v918_v32 }
  0xc9   : > { %1468 = vmatmul.mubr.msk.bf16.vlgmr.msra.gmra.mrb[0].mxu1 %vm202_vm3, %v1399_v34 }
  0xca   : > { %1472 = vmatpush3.bf16.msra.mxu1 %v929_v36  ;;  %1473 = vmatprep.mubr.msk.bf16.mxu1 %vm1595_vm0, %v1594_v3 }
  0xcb   : > { %1477 = vmatprep.subr.bf16.mxu1 %v1594_v3 }
  0xcc   : > { %1401 = vmatmul.mubr.msk.bf16.vlgmr.msra.gmra.mrb[0].mxu0 %vm202_vm3, %v1399_v34 }
  0xcd   : > { %932 = vmatpush1.bf16.msra.mxu0 %v923_v39  ;;  %963 = vmatprep.mubr.bf16.mxu0 %v1596_v6 }
  0xce   : > { %1408 = vmatprep.subr.msk.bf16.mxu0 %vm206_vm1, %v1043_v40 }
  0xd5   : > { %1474 = vmatmul.mubr.msk.bf16.vlgmr.msra.gmra.mrb[0].mxu1 %vm202_vm3, %v1403_v42 }
  0xd6   : > { %1478 = vmatpush3.bf16.msra.mxu1 %v1054_v44  ;;  %1479 = vmatprep.mubr.msk.bf16.mxu1 %vm1595_vm0, %v1594_v3 }
  0xd7   : > { %1483 = vmatprep.subr.bf16.mxu1 %v1594_v3 }
  0xd8   : > { %1405 = vmatmul.mubr.msk.bf16.vlgmr.msra.gmra.mrb[0].mxu0 %vm202_vm3, %v1403_v42 }
  0xd9   : > { %1057 = vmatpush1.bf16.msra.mxu0 %v1048_v47  ;;  %1088 = vmatprep.mubr.bf16.mxu0 %v1596_v6 }
  0xda   : > { %1412 = vmatprep.subr.msk.bf16.mxu0 %vm206_vm1, %v1168_v48 }
  0xe1   : > { %1480 = vmatmul.mubr.msk.bf16.vlgmr.msra.gmra.mrb[0].mxu1 %vm202_vm3, %v1407_v49 }
  0xe2   : > { %1484 = vmatpush3.bf16.msra.mxu1 %v1179_v51  ;;  %1485 = vmatprep.mubr.msk.bf16.mxu1 %vm1595_vm0, %v1594_v3  ;;  %v1265_v3 = vld [vmem:[%s1810_s2] sm:$0x7] }
  0xe3   : > { %v1270_v58 = vrot.slane %v1265_v3, %v1269_v55  ;;  %v1274_v60 = vrot.slane %v1265_v3, %v1273_v56 }
  0xe4   : > { %1409 = vmatmul.mubr.msk.bf16.vlgmr.msra.gmra.mrb[0].mxu0 %vm202_vm3, %v1407_v49 }
  0xe5   : > { %1182 = vmatpush1.bf16.msra.mxu0 %v1173_v52  ;;  %1213 = vmatprep.mubr.bf16.mxu0 %v1596_v6  ;;  %v1278_v6 = vrot.slane %v1265_v3, %v1277_v54 }
  0xed   : > { %1486 = vmatmul.mubr.msk.bf16.vlgmr.msra.gmra.mrb[0].mxu1 %vm202_vm3, %v1411_v53 }
  0xf0   : > { %1413 = vmatmul.mubr.msk.bf16.vlgmr.msra.gmra.mrb[0].mxu0 %vm202_vm3, %v1411_v53 }
 0x1c0   : > { %v1256_v57 = vpop.f32.mrb[0].mxu1 }
 0x1c1   : > { %v1487_v59 = vpop.f32.mrb[1].mxu1  ;;  %v1284_v0 = vmul.f32 %v1278_v6, %v1256_v57 }
 0x1c2   : > { %v1259_v61 = vpop.f32.mrb[2].mxu1 }
 0x1c3   : > { %v1215_v62 = vpop.f32.mrb[0].mxu0  ;;  %v1488_v63 = vpop.f32.mrb[3].mxu1  ;;  %v1287_v10 = vsel %vm1286_vm11, %v1284_v0, 0.0 }
 0x1c4   : > { %v1282_v1 = vmul.f32 %v1270_v58, %v1215_v62  ;;  %v1217_v2 = vpop.f32.mrb[1].mxu0 }
 0x1c5   : > { %v1283_v5 = vmul.f32 %v1274_v60, %v1217_v2  ;;  %v1219_v7 = vpop.f32.mrb[2].mxu0 }
 0x1c6   : > { %v1220_v8 = vpop.f32.mrb[3].mxu0 }
 0x1c7   : > { %v1285_v9 = vadd.f32 %v1283_v5, %v1282_v1 }
 0x1c9   : > { %v1288_v11 = vadd.f32 %v1287_v10, %v1285_v9 }
 0x1cb   : > { %1289 = vadd.xlane.f32.xlu0 %v1288_v11 }
 0x258   : > { %v1290_v4 = vpop.xlane.xlu0 %1289 }
 0x259   : > { %v1291_v12 = vmul.f32 0.00390625, %v1290_v4 }
 0x25b   : > { %v1292_v13 = vsub.f32 %v1215_v62, %v1291_v12  ;;  %v1293_v14 = vsub.f32 %v1217_v2, %v1291_v12  ;;  %v1294_v15 = vsub.f32 %v1256_v57, %v1291_v12 }
 0x25d   : > { %v1295_v16 = vmul.f32 %v1292_v13, %v1270_v58  ;;  %v1296_v17 = vmul.f32 %v1293_v14, %v1274_v60  ;;  %v1297_v18 = vmul.f32 %v1294_v15, %v1278_v6 }
 0x25f   : > { %v1298_v19 = vmul.f32 %v1295_v16, %v1295_v16  ;;  %v1299_v20 = vmul.f32 %v1296_v17, %v1296_v17  ;;  %v1300_v21 = vmul.f32 %v1297_v18, %v1297_v18 }
 0x261   : > { %v1301_v22 = vadd.f32 %v1299_v20, %v1298_v19  ;;  %v1302_v23 = vsel %vm1286_vm11, %v1300_v21, 0.0 }
 0x263   : > { %v1303_v24 = vadd.f32 %v1302_v23, %v1301_v22 }
 0x265   : > { %1304 = vadd.xlane.f32.xlu1 %v1303_v24 }
 0x2f2   : > { %v1305_v25 = vpop.xlane.xlu1 %1304 }
 0x2f3   : > { %v1306_v26 = vmul.f32 0.00390625, %v1305_v25 }
 0x2f5   : > { %v1307_v27 = vadd.f32 1e-05, %v1306_v26 }
 0x2f7   : > { %1583 = vrsqrt.f32 %v1307_v27 }
 0x301   : > { %v1584_v28 = vpop.eup %1583 }
 0x302   : > { %v1309_v29 = vmul.f32 %v1584_v28, %v1295_v16  ;;  %v1310_v30 = vmul.f32 %v1584_v28, %v1296_v17  ;;  %v1311_v31 = vmul.f32 %v1584_v28, %v1297_v18 }
 0x304   : > { %v1312_v32 = vmax.f32 %v1309_v29, 0.0  ;;  %v1313_v33 = vmax.f32 %v1310_v30, 0.0  ;;  %v1314_v34 = vmax.f32 %v1311_v31, 0.0 }
 0x306   : > { %1315 = vst [vmem:[%s170_s24] sm:$0xff] %v1312_v32  ;;  %1316 = vst [vmem:[%s170_s24 + $0x8] sm:$0xff] %v1313_v33 }
 0x307   : > { %1317 = vst.msk [vmem:[%s170_s24 + $0x10] sm:$0xff] %vm1286_vm11, %v1314_v34 }
 0x308 PF: > { %s13_s12 = sadd.s32 1, %s1591_s12  }
 0x309   : > { %p10_p4 = scmp.ge.s32.totalorder %s13_s12, 4  }
 0x30b   :  { %12 = sbr.rel (!%p10_p4) target bundleno = 1 (0x1), region = 70 }

</bundles_post_ra>
